<compile_context>
chip_gen: v6e
topology: v6e:2x2x1
jax: 0.10.0
libtpu: 0.0.40
codegen_flags: <defaults>
</compile_context>

<pallas_src>
import numpy as np
import jax
import jax.numpy as jnp
from jax.experimental import pallas as pl
from jax.experimental.pallas import tpu as pltpu

_LANE = 128
_SUBLANE = 8


def _round_up(n, m):
    return (n + m - 1) // m * m


def _cdiv(a, b):
    return (a + b - 1) // b


def _discriminator_kernel(x_ref, w1_ref, b1_ref, w2_ref, b2_ref, w3_ref, b3_ref,
                          out_ref):
    # Cast the activation tile to bf16 in VMEM (avoids a separate XLA pad/cast
    # pass over x in HBM).  f32 accumulation on the MXU throughout.
    x = x_ref[...].astype(w1_ref.dtype)
    # Layer 1: Linear(obs_dim -> 256) + ReLU
    h1 = jnp.dot(x, w1_ref[...], preferred_element_type=jnp.float32)
    h1 = jnp.maximum(h1 + b1_ref[...], 0.0)
    # Layer 2: Linear(256 -> 256) + ReLU  (full-width MXU pass)
    h2 = jnp.dot(h1.astype(w2_ref.dtype), w2_ref[...],
                 preferred_element_type=jnp.float32)
    h2 = jnp.maximum(h2 + b2_ref[...], 0.0)
    # Classifier: Linear(256 -> num_skills), no activation, compact store.
    logits = jnp.dot(h2.astype(w3_ref.dtype), w3_ref[...],
                     preferred_element_type=jnp.float32)
    out_ref[...] = (logits + b3_ref[...]).astype(out_ref.dtype)


def _choose_batch_tile(batch, block_batch):
    """Tile the batch with minimal padding, >=2 grid steps when possible
    (v7x megacore), and tb a multiple of 8 sublanes."""
    block_batch = max(_SUBLANE, _round_up(block_batch, _SUBLANE))
    batch_r = _round_up(batch, _SUBLANE)
    n_tiles = max(_cdiv(batch_r, block_batch), min(2, batch_r // _SUBLANE))
    tb = _round_up(_cdiv(batch_r, n_tiles), _SUBLANE)
    batch_pad = _round_up(batch, tb)
    return tb, batch_pad


def discriminator_forward(x, prepared_params, *, block_batch=1024):
    """Fused 3-layer MLP forward.

    x: (batch, obs_dim) float32.
    prepared_params: output of prepare_discriminator_params (bf16 weights,
    f32 row-vector biases) -- prep is done once, not per call.
    Returns (batch, num_skills) float32 logits.
    """
    w1, b1 = prepared_params["w1"], prepared_params["b1"]
    w2, b2 = prepared_params["w2"], prepared_params["b2"]
    w3, b3 = prepared_params["w3"], prepared_params["b3"]

    batch, obs_dim = x.shape
    hidden = w1.shape[1]
    num_skills = w3.shape[1]

    tb, batch_pad = _choose_batch_tile(batch, block_batch)
    grid = batch_pad // tb

    # Only the batch axis is padded (zero-filled so padded rows are benign).
    if batch_pad != batch:
        x_in = jnp.pad(x, ((0, batch_pad - batch), (0, 0)))
    else:
        x_in = x

    vmem = pltpu.MemorySpace.VMEM

    def resident(a):  # weight/bias block: same (0,...,0) block every iteration
        return pl.BlockSpec(a.shape, lambda i: (0,) * a.ndim, memory_space=vmem)

    flops = 2 * batch_pad * (obs_dim * hidden + hidden * hidden
                             + hidden * num_skills)
    bytes_accessed = (x_in.size * 4
                      + (w1.size + w2.size + w3.size) * 2
                      + (b1.size + b2.size + b3.size) * 4
                      + batch_pad * num_skills * 4)

    out = pl.pallas_call(
        _discriminator_kernel,
        out_shape=jax.ShapeDtypeStruct((batch_pad, num_skills), jnp.float32),
        grid=(grid,),
        in_specs=[
            # x block: last dim == full obs_dim (legal even when < 128).
            pl.BlockSpec((tb, obs_dim), lambda i: (i, 0), memory_space=vmem),
            resident(w1), resident(b1),
            resident(w2), resident(b2),
            resident(w3), resident(b3),
        ],
        # Compact output: last dim == full num_skills (no 128-wide f32 slab).
        out_specs=pl.BlockSpec((tb, num_skills), lambda i: (i, 0),
                               memory_space=vmem),
        compiler_params=pltpu.CompilerParams(
            dimension_semantics=("parallel",)),
        cost_estimate=pl.CostEstimate(flops=flops, transcendentals=0,
                                      bytes_accessed=bytes_accessed),
    )(x_in, w1, b1, w2, b2, w3, b3)

    # Footprint @ tb=1024: ~4 MiB (tiles + residents + h1/h2), well under the
    # 32 MiB scoped-VMEM default on all generations (incl. v7x's 64 MiB VMEM).
    if batch_pad != batch:
        out = out[:batch]
    return out


def prepare_discriminator_params(params):
    """One-time parameter prep (hoisted out of the per-call forward):
    bf16 MXU weights in (in, out) layout, f32 row-vector biases."""
    bf16 = jnp.bfloat16
    return {
        "w1": params["w1"].astype(bf16),
        "b1": params["b1"].reshape(1, -1).astype(jnp.float32),
        "w2": params["w2"].astype(bf16),
        "b2": params["b2"].reshape(1, -1).astype(jnp.float32),
        "w3": params["w3"].astype(bf16),
        "b3": params["b3"].reshape(1, -1).astype(jnp.float32),
    }


def init_discriminator_params(key, obs_dim, num_skills, hidden=256):
    """Deterministic init matching the PyTorch module:
       orthogonal(gain=sqrt(2)) for hidden layers, orthogonal(gain=0.01) for
       the classifier, zero biases. Weights stored as (in, out)."""
    k1, k2, k3 = jax.random.split(key, 3)
    ortho = jax.nn.initializers.orthogonal

    # PyTorch orthogonal_ acts on W of shape (out, in); transpose to (in, out).
    w1 = ortho(scale=np.sqrt(2))(k1, (hidden, obs_dim), jnp.float32).T
    w2 = ortho(scale=np.sqrt(2))(k2, (hidden, hidden), jnp.float32).T
    w3 = ortho(scale=0.01)(k3, (num_skills, hidden), jnp.float32).T

    return {
        "w1": jnp.asarray(w1), "b1": jnp.zeros((hidden,), jnp.float32),
        "w2": jnp.asarray(w2), "b2": jnp.zeros((hidden,), jnp.float32),
        "w3": jnp.asarray(w3), "b3": jnp.zeros((num_skills,), jnp.float32),
    }


def _reference_forward(x, params):
    # Same numerics as the kernel: bf16 operands, f32 accumulation.
    # (~1e-3 rel. error vs the pure-f32 PyTorch Discriminator.)
    def lin(a, w, b):
        return jnp.dot(a.astype(jnp.bfloat16), w.astype(jnp.bfloat16),
                       preferred_element_type=jnp.float32) + b
    h = jnp.maximum(lin(x, params["w1"], params["b1"]), 0.0)
    h = jnp.maximum(lin(h, params["w2"], params["b2"]), 0.0)
    return lin(h, params["w3"], params["b3"])


if __name__ == "__main__":
    key = jax.random.PRNGKey(0)
    k_params, k_x = jax.random.split(key)

    batch, obs_dim, num_skills = 10, 32, 8   # non-multiple-of-8 batch: pads
    params = init_discriminator_params(k_params, obs_dim, num_skills)
    prepared = prepare_discriminator_params(params)
    x = jax.random.normal(k_x, (batch, obs_dim), dtype=jnp.float32)

    logits = discriminator_forward(x, prepared)
    jax.block_until_ready(logits)
    assert logits.shape == (batch, num_skills)

    ref = _reference_forward(x, params)
    np.testing.assert_allclose(np.asarray(logits), np.asarray(ref),
                               rtol=1e-3, atol=1e-3)

    print("KERNEL_OK")
</pallas_src>

<mosaic_0001>
module attributes {stable_mosaic.version = 11 : i64} {
  func.func @_discriminator_kernel(%arg0: i32, %arg1: memref<8x32xf32, #tpu.memory_space<vmem>>, %arg2: memref<32x256xbf16, #tpu.memory_space<vmem>>, %arg3: memref<1x256xf32, #tpu.memory_space<vmem>>, %arg4: memref<256x256xbf16, #tpu.memory_space<vmem>>, %arg5: memref<1x256xf32, #tpu.memory_space<vmem>>, %arg6: memref<256x8xbf16, #tpu.memory_space<vmem>>, %arg7: memref<1x8xf32, #tpu.memory_space<vmem>>, %arg8: memref<8x8xf32, #tpu.memory_space<vmem>>) attributes {dimension_semantics = [#tpu.dimension_semantics<parallel>], iteration_bounds = array<i64: 2>, scalar_prefetch = 0 : i64, scratch_operands = 0 : i64, tpu.core_type = #tpu.core_type<tc>, window_params = [{transform_indices = @transform_0, window_bounds = array<i64: 8, 32>}, {pipeline_mode = #tpu.pipeline_mode<synchronous>, transform_indices = @transform_1, window_bounds = array<i64: 32, 256>}, {pipeline_mode = #tpu.pipeline_mode<synchronous>, transform_indices = @transform_2, window_bounds = array<i64: 1, 256>}, {pipeline_mode = #tpu.pipeline_mode<synchronous>, transform_indices = @transform_3, window_bounds = array<i64: 256, 256>}, {pipeline_mode = #tpu.pipeline_mode<synchronous>, transform_indices = @transform_4, window_bounds = array<i64: 1, 256>}, {pipeline_mode = #tpu.pipeline_mode<synchronous>, transform_indices = @transform_5, window_bounds = array<i64: 256, 8>}, {pipeline_mode = #tpu.pipeline_mode<synchronous>, transform_indices = @transform_6, window_bounds = array<i64: 1, 8>}, {transform_indices = @transform_7, window_bounds = array<i64: 8, 8>}]} {
    %c0 = arith.constant 0 : index
    %c0_0 = arith.constant 0 : index
    %0 = vector.load %arg1[%c0, %c0_0] : memref<8x32xf32, #tpu.memory_space<vmem>>, vector<8x32xf32>
    %1 = arith.truncf %0 : vector<8x32xf32> to vector<8x32xbf16>
    %c0_1 = arith.constant 0 : index
    %c0_2 = arith.constant 0 : index
    %2 = vector.load %arg2[%c0_1, %c0_2] : memref<32x256xbf16, #tpu.memory_space<vmem>>, vector<32x256xbf16>
    %cst = arith.constant dense<0.000000e+00> : vector<8x256xf32>
    %3 = tpu.matmul %1, %2, %cst {dimension_numbers = #tpu.dot_dimension_numbers<[1], [0], [0], [1], [0, 0, 1, 1], [], []>} : vector<8x32xbf16>, vector<32x256xbf16>, vector<8x256xf32> -> vector<8x256xf32>
    %c0_3 = arith.constant 0 : index
    %c0_4 = arith.constant 0 : index
    %4 = vector.load %arg3[%c0_3, %c0_4] : memref<1x256xf32, #tpu.memory_space<vmem>>, vector<1x256xf32>
    %5 = vector.broadcast %4 : vector<1x256xf32> to vector<8x256xf32>
    %6 = arith.addf %3, %5 : vector<8x256xf32>
    %cst_5 = arith.constant 0.000000e+00 : f32
    %7 = vector.broadcast %cst_5 : f32 to vector<8x256xf32>
    %8 = arith.maximumf %6, %7 : vector<8x256xf32>
    %9 = arith.truncf %8 : vector<8x256xf32> to vector<8x256xbf16>
    %c0_6 = arith.constant 0 : index
    %c0_7 = arith.constant 0 : index
    %10 = vector.load %arg4[%c0_6, %c0_7] : memref<256x256xbf16, #tpu.memory_space<vmem>>, vector<256x256xbf16>
    %cst_8 = arith.constant dense<0.000000e+00> : vector<8x256xf32>
    %11 = tpu.matmul %9, %10, %cst_8 {dimension_numbers = #tpu.dot_dimension_numbers<[1], [0], [0], [1], [0, 0, 1, 1], [], []>} : vector<8x256xbf16>, vector<256x256xbf16>, vector<8x256xf32> -> vector<8x256xf32>
    %c0_9 = arith.constant 0 : index
    %c0_10 = arith.constant 0 : index
    %12 = vector.load %arg5[%c0_9, %c0_10] : memref<1x256xf32, #tpu.memory_space<vmem>>, vector<1x256xf32>
    %13 = vector.broadcast %12 : vector<1x256xf32> to vector<8x256xf32>
    %14 = arith.addf %11, %13 : vector<8x256xf32>
    %cst_11 = arith.constant 0.000000e+00 : f32
    %15 = vector.broadcast %cst_11 : f32 to vector<8x256xf32>
    %16 = arith.maximumf %14, %15 : vector<8x256xf32>
    %17 = arith.truncf %16 : vector<8x256xf32> to vector<8x256xbf16>
    %c0_12 = arith.constant 0 : index
    %c0_13 = arith.constant 0 : index
    %18 = vector.load %arg6[%c0_12, %c0_13] : memref<256x8xbf16, #tpu.memory_space<vmem>>, vector<256x8xbf16>
    %cst_14 = arith.constant dense<0.000000e+00> : vector<8x8xf32>
    %19 = tpu.matmul %17, %18, %cst_14 {dimension_numbers = #tpu.dot_dimension_numbers<[1], [0], [0], [1], [0, 0, 1, 1], [], []>} : vector<8x256xbf16>, vector<256x8xbf16>, vector<8x8xf32> -> vector<8x8xf32>
    %c0_15 = arith.constant 0 : index
    %c0_16 = arith.constant 0 : index
    %20 = vector.load %arg7[%c0_15, %c0_16] : memref<1x8xf32, #tpu.memory_space<vmem>>, vector<1x8xf32>
    %21 = vector.broadcast %20 : vector<1x8xf32> to vector<8x8xf32>
    %22 = arith.addf %19, %21 : vector<8x8xf32>
    %c0_17 = arith.constant 0 : index
    %c0_18 = arith.constant 0 : index
    %23 = vector.load %arg8[%c0_17, %c0_18] : memref<8x8xf32, #tpu.memory_space<vmem>>, vector<8x8xf32>
    tpu.vector_store %arg8[%c0_17, %c0_18], %22 {strides = array<i32>} : memref<8x8xf32, #tpu.memory_space<vmem>>, vector<8x8xf32>,
    return
  }
  func.func @transform_0(%arg0: i32) -> (i32, i32) {
    %c0_i32 = arith.constant 0 : i32
    %c0_i32_0 = arith.constant 0 : i32
    return %arg0, %c0_i32 : i32, i32
  }
  func.func @transform_1(%arg0: i32) -> (i32, i32) {
    %c0_i32 = arith.constant 0 : i32
    %c0_i32_0 = arith.constant 0 : i32
    %c0_i32_1 = arith.constant 0 : i32
    return %c0_i32, %c0_i32_0 : i32, i32
  }
  func.func @transform_2(%arg0: i32) -> (i32, i32) {
    %c0_i32 = arith.constant 0 : i32
    %c0_i32_0 = arith.constant 0 : i32
    %c0_i32_1 = arith.constant 0 : i32
    return %c0_i32, %c0_i32_0 : i32, i32
  }
  func.func @transform_3(%arg0: i32) -> (i32, i32) {
    %c0_i32 = arith.constant 0 : i32
    %c0_i32_0 = arith.constant 0 : i32
    %c0_i32_1 = arith.constant 0 : i32
    return %c0_i32, %c0_i32_0 : i32, i32
  }
  func.func @transform_4(%arg0: i32) -> (i32, i32) {
    %c0_i32 = arith.constant 0 : i32
    %c0_i32_0 = arith.constant 0 : i32
    %c0_i32_1 = arith.constant 0 : i32
    return %c0_i32, %c0_i32_0 : i32, i32
  }
  func.func @transform_5(%arg0: i32) -> (i32, i32) {
    %c0_i32 = arith.constant 0 : i32
    %c0_i32_0 = arith.constant 0 : i32
    %c0_i32_1 = arith.constant 0 : i32
    return %c0_i32, %c0_i32_0 : i32, i32
  }
  func.func @transform_6(%arg0: i32) -> (i32, i32) {
    %c0_i32 = arith.constant 0 : i32
    %c0_i32_0 = arith.constant 0 : i32
    %c0_i32_1 = arith.constant 0 : i32
    return %c0_i32, %c0_i32_0 : i32, i32
  }
  func.func @transform_7(%arg0: i32) -> (i32, i32) {
    %c0_i32 = arith.constant 0 : i32
    %c0_i32_0 = arith.constant 0 : i32
    return %arg0, %c0_i32 : i32, i32
  }
}

</mosaic_0001>

<bundles_post_ra>
// kernel: tpu_custom_call.1
= control target key start
LH: loop header
LB: loop body
LE: loop exit
PB: predicated region body
PF: predicated region fallthrough
CT: control target
= control target key end

     0   :  { %12 = vsyncpa [#allocation3], 0  ;;  %s1129_s24 = smov 0   ;;  %s1236_s0 = inlined_call_operand.vmem [shape: f32[16,32], index: 0, kind: input, shape index: {}]   ;;  %s1237_s1 = inlined_call_operand.vmem [shape: bf16[32,256], index: 1, kind: input, shape index: {}]   ;;  %s1238_s2 = inlined_call_operand.vmem [shape: f32[1,256], index: 2, kind: input, shape index: {}]   ;;  %s1239_s3 = inlined_call_operand.hbm [shape: bf16[256,256], index: 3, kind: input, shape index: {}]   ;;  %s1240_s4 = inlined_call_operand.vmem [shape: f32[1,256], index: 4, kind: input, shape index: {}]   ;;  %s1241_s5 = inlined_call_operand.vmem [shape: bf16[256,8], index: 5, kind: input, shape index: {}]   ;;  %s1242_s6 = inlined_call_operand.vmem [shape: f32[1,8], index: 6, kind: input, shape index: {}]   ;;  %s1243_s7 = inlined_call_operand.vmem [shape: f32[16,8], index: 7, kind: output, shape index: {}]  }
   0x1 LB: > { %s868_s25 = sadd.s32 4294967295, %s1083_s24   ;;  %p870_p0 = scmp.ge.s32.totalorder %s1083_s24, 1  ;;  %s1083_s24 = sphi %s1129_s24, %s18_s24  }
   0x2   : > { %p201_p1 = scmp.lt.s32.totalorder %s1083_s24, 3  ;;  %s1085_s26 = smov [#allocation2]  }
   0x3   : > { %s219_s27 = sshll.u32 %s1085_s26, 4  ;;  %p963_p3 = scmp.eq.s32.totalorder %s868_s25, 0  ;;  %s220_s27 = int_to_ptr.vmem [resolvable:$true] %s219_s27 }
   0x4   : > { %p1137_p2 = pnand %p870_p0, %p201_p1  ;;  %s1058_s29 = scalar_lea.vmem %s220_s27, 4096 }
   0x5   : > { %p1059_p7 = scmp.ne.s32.totalorder %s220_s27, %s1058_s29  ;;  %p1066_p10 = scmp.lt.s32.totalorder %s220_s27, %s220_s27 }
   0x6   : > { %p959_p4 = pneg %p1137_p2  ;;  %p1067_p11 = scmp.lt.s32.totalorder %s1058_s29, %s1058_s29 }
   0x8   : > { %p960_p5 = pnand %p963_p3, %p959_p4  ;;  %p1068_p12 = por %p1067_p11, %p1066_p10 }
   0xa   : > { %p1049_p6 = pneg %p960_p5 }
   0xc   : > { %p1061_p8 = pnand %p1059_p7, %p1049_p6 }
   0xe   : > { %p1062_p9 = pneg %p1061_p8 }
  0x10   : > { %p1069_p13 = pnand %p1068_p12, %p1062_p9 }
  0x12   : > { %1072 = shalt.err (!%p1069_p13)
}
  0x13   : > { %s1086_s30 = smov 128   ;;  %s1087_s8 = smov 8  }
  0x14   : > { %962 = dma.hbm_to_vmem [thread:$0]  (!%p960_p5), %s1239_s3, 4096, %s220_s27, [#allocation3], %s1086_s30, %s1086_s30, %s1087_s8  }
  0x15   : > { %251 = sbr.rel (%p1137_p2) target bundleno = 640 (0x280), region = 48 }
  0x1a   : > { %1078 = dma.done.wait (%p963_p3), [#allocation3], 4096  }
  0x1b   : > { %1080 = vsyncadd (%p963_p3), [#allocation3], 4294963200  ;;  %p281_p0 = scmp.lt.s32.totalorder %s868_s25, 1  ;;  %v1088_v0 = vmov 0   ;;  %v977_v1 = vld [vmem:[%s1237_s1 + $0x14] ss:$8 sps:$4 sm:$0xff]   ;;  %v298_v51 = vlaneseq }
  0x1c   : > { %364 = vmatprep.mubr.bf16.mxu0 %v1088_v0  ;;  %v979_v2 = vld [vmem:[%s1237_s1 + $0x10] ss:$8 sps:$4 sm:$0xff]   ;;  %344 = vmatprep.subr.bf16.mxu0 %v977_v1  ;;  %v980_v3 = vld [vmem:[%s1237_s1 + $0x4] ss:$8 sps:$4 sm:$0xff]   ;;  %v982_v4 = vld [vmem:[%s1237_s1] ss:$8 sps:$4 sm:$0xff]  }
  0x1d   : > { %s1246_s25 = smov (!%p281_p0, %s868_s25), 1  ;;  %345 = vmatpush1.bf16.msra.mxu0 %v979_v2  ;;  %v983_v6 = vld [vmem:[#allocation2 + $0x74] ss:$8 sps:$4 sm:$0xff]   ;;  %v985_v7 = vld [vmem:[#allocation2 + $0x70] ss:$8 sps:$4 sm:$0xff]   ;;  %vm328_vm0 = vcmask 261120  }
  0x1e   : > { %s875_s11 = sshll.u32 %s1246_s25, 3  ;;  %346 = vmatprep.subr.bf16.mxu0 %v980_v3  ;;  %581 = vmatprep.subr.bf16.mxu1 %v983_v6  ;;  %v986_v8 = vld [vmem:[#allocation2 + $0x64] ss:$8 sps:$4 sm:$0xff]   ;;  %v988_v10 = vld [vmem:[#allocation2 + $0x60] ss:$8 sps:$4 sm:$0xff]   ;;  %v1031_v39 = vld [vmem:[%s1241_s5 + $0x78] sm:$0xff]  }
  0x1f   : > { %s284_s14 = scalar_lea.vmem %s1236_s0, %s875_s11  ;;  %582 = vmatpush1.bf16.msra.mxu1 %v985_v7  ;;  %v989_v11 = vld [vmem:[#allocation2 + $0x54] ss:$8 sps:$4 sm:$0xff]   ;;  %v991_v12 = vld [vmem:[#allocation2 + $0x50] ss:$8 sps:$4 sm:$0xff]   ;;  %v992_v13 = vld [vmem:[#allocation2 + $0x44] ss:$8 sps:$4 sm:$0xff]   ;;  %s288_s23 = scalar_lea.vmem %s1243_s7, %s875_s11 }
  0x20   : > { %v290_v5 = vld [vmem:[%s284_s14] sm:$0xff]  ;;  %583 = vmatprep.subr.bf16.mxu1 %v986_v8  ;;  %v995_v15 = vld [vmem:[#allocation2 + $0x34] ss:$8 sps:$4 sm:$0xff]   ;;  %v997_v16 = vld [vmem:[#allocation2 + $0x30] ss:$8 sps:$4 sm:$0xff]   ;;  %v299_v52 = vshrl.u32 %v298_v51, 7 }
  0x21   : > { %v291_v9 = vpack.c.bf16 %v290_v5, %v290_v5  ;;  %347 = vmatpush1.bf16.msra.mxu0 %v982_v4  ;;  %v994_v14 = vld [vmem:[#allocation2 + $0x40] ss:$8 sps:$4 sm:$0xff]   ;;  %v998_v17 = vld [vmem:[#allocation2 + $0x24] ss:$8 sps:$4 sm:$0xff]   ;;  %v1001_v19 = vld [vmem:[#allocation2 + $0x14] ss:$8 sps:$4 sm:$0xff]  }
  0x22   : > { %v1000_v18 = vld [vmem:[#allocation2 + $0x20] ss:$8 sps:$4 sm:$0xff]   ;;  %v1003_v20 = vld [vmem:[#allocation2 + $0x10] ss:$8 sps:$4 sm:$0xff]   ;;  %v1004_v21 = vld [vmem:[#allocation2 + $0x4] ss:$8 sps:$4 sm:$0xff]   ;;  %933 = vmatprep.subr.bf16.mxu0 %v1031_v39 }
  0x23   : > { %584 = vmatpush1.bf16.msra.mxu1 %v988_v10  ;;  %v1006_v22 = vld [vmem:[#allocation2] ss:$8 sps:$4 sm:$0xff]   ;;  %v1007_v23 = vld [vmem:[#allocation2 + $0xf4] ss:$8 sps:$4 sm:$0xff]   ;;  %v1009_v24 = vld [vmem:[#allocation2 + $0xf0] ss:$8 sps:$4 sm:$0xff]  }
  0x24   : > { %881 = vmatmul.mubr.msk.bf16.vlgmr.msra.gmra.mxu0 %vm328_vm0, %v291_v9  ;;  %585 = vmatprep.subr.bf16.mxu1 %v989_v11  ;;  %v1010_v25 = vld [vmem:[#allocation2 + $0xe4] ss:$8 sps:$4 sm:$0xff]   ;;  %v1012_v26 = vld [vmem:[#allocation2 + $0xe0] ss:$8 sps:$4 sm:$0xff]   ;;  %v1013_v27 = vld [vmem:[#allocation2 + $0xd4] ss:$8 sps:$4 sm:$0xff]  }
  0x25   : > { %v1015_v28 = vld [vmem:[#allocation2 + $0xd0] ss:$8 sps:$4 sm:$0xff]   ;;  %v1016_v29 = vld [vmem:[#allocation2 + $0xc4] ss:$8 sps:$4 sm:$0xff]   ;;  %v1018_v30 = vld [vmem:[#allocation2 + $0xc0] ss:$8 sps:$4 sm:$0xff]  }
  0x26   : > { %v1019_v31 = vld [vmem:[#allocation2 + $0xb4] ss:$8 sps:$4 sm:$0xff]   ;;  %v1021_v32 = vld [vmem:[#allocation2 + $0xb0] ss:$8 sps:$4 sm:$0xff]   ;;  %v1022_v33 = vld [vmem:[#allocation2 + $0xa4] ss:$8 sps:$4 sm:$0xff]  }
  0x27   : > { %586 = vmatpush1.bf16.msra.mxu1 %v991_v12  ;;  %v1024_v34 = vld [vmem:[#allocation2 + $0xa0] ss:$8 sps:$4 sm:$0xff]   ;;  %v1025_v35 = vld [vmem:[#allocation2 + $0x94] ss:$8 sps:$4 sm:$0xff]   ;;  %v1027_v36 = vld [vmem:[#allocation2 + $0x90] ss:$8 sps:$4 sm:$0xff]  }
  0x28   : > { %587 = vmatprep.subr.bf16.mxu1 %v992_v13  ;;  %v1028_v37 = vld [vmem:[#allocation2 + $0x84] ss:$8 sps:$4 sm:$0xff]   ;;  %v1030_v38 = vld [vmem:[#allocation2 + $0x80] ss:$8 sps:$4 sm:$0xff]   ;;  %v1032_v40 = vld [vmem:[%s1241_s5 + $0x38] sm:$0xff]   ;;  %v300_v53 = vsub.s32 0, %v299_v52 }
  0x29   : > { %v1033_v41 = vld [vmem:[%s1241_s5 + $0x70] sm:$0xff]   ;;  %934 = vmatpush3.bf16.msra.mxu0 %v1032_v40  ;;  %v1035_v43 = vld [vmem:[%s1241_s5 + $0x68] sm:$0xff]   ;;  %v1037_v45 = vld [vmem:[%s1241_s5 + $0x60] sm:$0xff]   ;;  %v304_v55 = vsub.s32 1, %v299_v52  ;;  %vm801_vm1 = vcmask 64512  }
  0x2a   : > { %v1034_v42 = vld [vmem:[%s1241_s5 + $0x30] sm:$0xff]   ;;  %935 = vmatprep.subr.bf16.mxu0 %v1033_v41  ;;  %v1036_v44 = vld [vmem:[%s1241_s5 + $0x28] sm:$0xff]   ;;  %v1038_v46 = vld [vmem:[%s1241_s5 + $0x20] sm:$0xff]  }
  0x2b   : > { %588 = vmatpush1.bf16.msra.mxu1 %v994_v14  ;;  %v1039_v47 = vld [vmem:[%s1241_s5 + $0x58] sm:$0xff]   ;;  %v1041_v49 = vld [vmem:[%s1241_s5 + $0x50] sm:$0xff]   ;;  %v296_v54 = vld [vmem:[%s1238_s2] sm:$0x3] }
  0x2c   : > { %589 = vmatprep.subr.bf16.mxu1 %v995_v15  ;;  %v1040_v48 = vld [vmem:[%s1241_s5 + $0x18] sm:$0xff]   ;;  %v1042_v50 = vld [vmem:[%s1241_s5 + $0x10] sm:$0xff]   ;;  %v301_v56 = vrot.slane %v296_v54, %v300_v53  ;;  %v305_v57 = vrot.slane %v296_v54, %v304_v55  ;;  %v1043_v4 = vld [vmem:[%s1241_s5 + $0x48] sm:$0xff]  }
  0x2d   : > { %936 = vmatpush3.bf16.msra.mxu0 %v1034_v42  ;;  %v1044_v5 = vld [vmem:[%s1241_s5 + $0x8] sm:$0xff]   ;;  %v1045_v6 = vld [vmem:[%s1241_s5 + $0x40] sm:$0xff]  }
  0x2e   : > { %937 = vmatprep.subr.bf16.mxu0 %v1035_v43  ;;  %v1046_v7 = vld [vmem:[%s1241_s5] sm:$0xff]  }
  0x2f   : > { %590 = vmatpush1.bf16.msra.mxu1 %v997_v16  ;;  %v409_v8 = vld [vmem:[%s1240_s4] sm:$0x3] }
  0x30   : > { %591 = vmatprep.subr.bf16.mxu1 %v998_v17  ;;  %v414_v9 = vrot.slane %v409_v8, %v300_v53  ;;  %v418_v10 = vrot.slane %v409_v8, %v304_v55 }
  0x31   : > { %938 = vmatpush3.bf16.msra.mxu0 %v1036_v44 }
  0x32   : > { %939 = vmatprep.subr.bf16.mxu0 %v1037_v45 }
  0x33   : > { %592 = vmatpush1.bf16.msra.mxu1 %v1000_v18 }
  0x34   : > { %593 = vmatprep.subr.bf16.mxu1 %v1001_v19 }
  0x35   : > { %940 = vmatpush3.bf16.msra.mxu0 %v1038_v46 }
  0x36   : > { %941 = vmatprep.subr.bf16.mxu0 %v1039_v47 }
  0x37   : > { %594 = vmatpush1.bf16.msra.mxu1 %v1003_v20 }
  0x38   : > { %595 = vmatprep.subr.bf16.mxu1 %v1004_v21 }
  0x39   : > { %942 = vmatpush3.bf16.msra.mxu0 %v1040_v48 }
  0x3a   : > { %943 = vmatprep.subr.bf16.mxu0 %v1041_v49 }
  0x3b   : > { %596 = vmatpush1.bf16.msra.mxu1 %v1006_v22  ;;  %v914_v22 = vld [vmem:[%s1242_s6] ss:$0 sm:$0xff] }
  0x3c   : > { %597 = vmatprep.subr.bf16.mxu1 %v1007_v23 }
  0x3d   : > { %944 = vmatpush3.bf16.msra.mxu0 %v1042_v50 }
  0x3e   : > { %945 = vmatprep.subr.bf16.mxu0 %v1043_v4 }
  0x3f   : > { %598 = vmatpush2.bf16.msra.mxu1 %v1009_v24 }
  0x40   : > { %599 = vmatprep.subr.bf16.mxu1 %v1010_v25 }
  0x41   : > { %946 = vmatpush3.bf16.msra.mxu0 %v1044_v5 }
  0x42   : > { %947 = vmatprep.subr.bf16.mxu0 %v1045_v6 }
  0x43   : > { %600 = vmatpush2.bf16.msra.mxu1 %v1012_v26 }
  0x44   : > { %601 = vmatprep.subr.bf16.mxu1 %v1013_v27 }
  0x45   : > { %948 = vmatpush3.bf16.msra.mxu0 %v1046_v7 }
  0x47   : > { %602 = vmatpush2.bf16.msra.mxu1 %v1015_v28 }
  0x48   : > { %603 = vmatprep.subr.bf16.mxu1 %v1016_v29 }
  0x4b   : > { %604 = vmatpush2.bf16.msra.mxu1 %v1018_v30 }
  0x4c   : > { %605 = vmatprep.subr.bf16.mxu1 %v1019_v31 }
  0x4f   : > { %606 = vmatpush2.bf16.msra.mxu1 %v1021_v32 }
  0x50   : > { %607 = vmatprep.subr.bf16.mxu1 %v1022_v33 }
  0x53   : > { %608 = vmatpush2.bf16.msra.mxu1 %v1024_v34 }
  0x54   : > { %609 = vmatprep.subr.bf16.mxu1 %v1025_v35 }
  0x57   : > { %610 = vmatpush2.bf16.msra.mxu1 %v1027_v36 }
  0x58   : > { %611 = vmatprep.subr.bf16.mxu1 %v1028_v37 }
  0x5b   : > { %612 = vmatpush2.bf16.msra.mxu1 %v1030_v38 }
  0xe4   : > { %v366_v58 = vpop.f32.mrf.mxu0 }
  0xe5   : > { %v367_v59 = vadd.f32 %v366_v58, %v301_v56 }
  0xe6   : > { %v368_v60 = vpop.f32.mrf.mxu0 }
  0xe7   : > { %v369_v61 = vadd.f32 %v368_v60, %v305_v57  ;;  %v373_v62 = vmax.f32 %v367_v59, 0.0 }
  0xe8   : > { %v370_v63 = vpop.f32.mrf.mxu0 }
  0xe9   : > { %v374_v0 = vmax.f32 %v369_v61, 0.0  ;;  %v375_v3 = vpack.c.bf16 %v373_v62, %v373_v62 }
  0xea   : > { %v371_v1 = vpop.f32.mrf.mxu0 }
  0xeb   : > { %v376_v2 = vpack.c.bf16 %v374_v0, %v374_v0 }
  0xed   : > { %613 = vmatprep.mubr.bf16.mxu1 %v376_v2 }
  0xee   : > { %614 = vmatmul.mubr.bf16.vlgmr.msra.gmra.mxu1 %v375_v3 }
 0x1ae   : > { %v615_v11 = vpop.f32.mrf.mxu1 }
 0x1af   : > { %v616_v12 = vadd.f32 %v615_v11, %v414_v9 }
 0x1b0   : > { %v617_v13 = vpop.f32.mrf.mxu1 }
 0x1b1   : > { %v618_v14 = vadd.f32 %v617_v13, %v418_v10  ;;  %v622_v15 = vmax.f32 %v616_v12, 0.0 }
 0x1b2   : > { %v619_v16 = vpop.f32.mrf.mxu1 }
 0x1b3   : > { %v623_v17 = vmax.f32 %v618_v14, 0.0  ;;  %v624_v20 = vpack.c.bf16 %v622_v15, %v622_v15 }
 0x1b4   : > { %v620_v18 = vpop.f32.mrf.mxu1 }
 0x1b5   : > { %v625_v19 = vpack.c.bf16 %v623_v17, %v623_v17 }
 0x1b7   : > { %793 = vmatprep.mubr.bf16.mxu0 %v625_v19 }
 0x1b8   : > { %794 = vmatmul.mubr.bf16.vlgmr.msra.gmra.mxu0 %v624_v20 }
 0x278   : > { %v949_v21 = vpop.f32.mrf.mxu0 }
 0x27a   : > { %v950_v23 = vpop.f32.mrf.mxu0 }
 0x27b   : > { %v951_v24 = vadd.f32 %v950_v23, %v949_v21 }
 0x27c   : > { %v952_v25 = vpop.f32.mrf.mxu0 }
 0x27d   : > { %v796_v26 = vadd.f32 %v951_v24, %v914_v22 }
 0x27e   : > { %v953_v27 = vpop.f32.mrf.mxu0 }
 0x27f   : > { %802 = vst.msk [vmem:[%s288_s23] sm:$0xff] %vm801_vm1, %v796_v26 }
 0x280 PF: > { %s18_s24 = sadd.s32 1, %s1083_s24  }
 0x281   : > { %p15_p1 = scmp.ge.s32.totalorder %s18_s24, 4  }
 0x283   :  { %17 = sbr.rel (!%p15_p1) target bundleno = 1 (0x1), region = 83 }
 0x288   :  { %822 = vsyncpa [#allocation3], 1 }
 0x289   :  { %824 = vsyncpa [#allocation3 + $0x1], 1 }

</bundles_post_ra>
